<compile_context>
chip_gen: v7x
topology: tpu7x:2x2x1
jax: 0.10.0
libtpu: 0.0.40
codegen_flags: <defaults>
</compile_context>

<pallas_src>
import functools
import math

import jax
import jax.numpy as jnp
from jax.experimental import pallas as pl
from jax.experimental.pallas import tpu as pltpu


def _column_sum_kernel(trg_ref, out_ref, acc_ref, *,
                       tiles_per_core, tile_rows, valid_rows, need_mask):
    """Accumulate the column-sum of the current trg tile into acc_ref; write the
    per-core partial to out_ref on the core's last grid step."""
    t = pl.program_id(1)

    @pl.when(t == 0)
    def _init():
        acc_ref[...] = jnp.zeros_like(acc_ref)

    x = trg_ref[...].astype(jnp.float32)                      # (tile_rows, width)
    if need_mask:
        c = pl.program_id(0)
        tile = c * tiles_per_core + t                         # unclamped global tile id
        row0 = tile * tile_rows
        rows = row0 + jax.lax.broadcasted_iota(jnp.int32, x.shape, 0)
        x = jnp.where(rows < valid_rows, x, 0.0)              # kill tail / phantom rows
    acc_ref[...] += jnp.sum(x, axis=0, keepdims=True)

    @pl.when(t == pl.num_programs(1) - 1)
    def _finish():
        out_ref[...] = acc_ref[...].reshape(out_ref.shape)


def attention_forward(src, trg, weight, bias, *,
                      node_tile=1024, vmem_tile_budget=24 << 20):
    """src: [src_size], trg: [middle_node, trg_size],
       weight: [1, src_size, trg_size] (nn.Bilinear layout), bias: [1].
       Returns (score [middle_node, 1], value [trg_size]).

       NOTE: src / weight / bias are accepted for interface compatibility but have
       no effect on the outputs -- nn.Softmax(dim=-1) over an [M, 1] tensor is
       identically 1.0, so score == 1 and value == column-sum(trg), exactly
       matching the PyTorch forward."""
    middle_node, trg_size = trg.shape
    out_dtype = trg.dtype

    # score == 1.0 exactly (size-1 softmax axis) -> produce in wrapper, no kernel stream.
    score = jnp.ones((middle_node, 1), dtype=out_dtype)

    # ---- lane-dense fold for narrow trg_size (free reshape, no HBM copy) ----
    k = 1
    if trg_size < 128 and middle_node > 1:
        k = math.gcd(middle_node, max(1, 128 // trg_size))
    m_fold = middle_node // k
    width = k * trg_size
    trg_f = trg.reshape(m_fold, width)

    # ---- node-tile sizing against a VMEM budget (input is double-buffered) ----
    row_bytes = width * trg.dtype.itemsize
    tm_cap = max(8, (vmem_tile_budget // 2) // max(row_bytes, 1))
    tm = min(node_tile, tm_cap)
    tm = max(8, (tm // 8) * 8)
    if m_fold <= tm:
        tm = m_fold                                   # single full-extent block
    n_tiles = pl.cdiv(m_fold, tm)

    # ---- split tile range across TensorCores (megacore / v7x dual-TC) ----
    p = 2 if n_tiles >= 2 else 1
    tiles_per_core = pl.cdiv(n_tiles, p)
    need_mask = (p * tiles_per_core * tm) != m_fold
    last_tile = n_tiles - 1

    def trg_map(c, t):
        idx = c * tiles_per_core + t
        if need_mask:
            # clamp phantom tiles into range; their rows are zero-masked in-kernel
            idx = jnp.minimum(idx, last_tile)
        return (idx, 0)

    kernel = functools.partial(
        _column_sum_kernel,
        tiles_per_core=tiles_per_core,
        tile_rows=tm,
        valid_rows=m_fold,
        need_mask=need_mask)

    partials = pl.pallas_call(
        kernel,
        out_shape=jax.ShapeDtypeStruct((p, 1, width), jnp.float32),
        grid_spec=pltpu.PrefetchScalarGridSpec(
            num_scalar_prefetch=0,
            grid=(p, tiles_per_core),
            in_specs=[pl.BlockSpec((tm, width), trg_map)],
            out_specs=pl.BlockSpec((1, 1, width), lambda c, t: (c, 0, 0)),
            scratch_shapes=[pltpu.VMEM((1, width), jnp.float32)],
        ),
        compiler_params=pltpu.CompilerParams(
            dimension_semantics=("parallel", "arbitrary"),
            vmem_limit_bytes=48 << 20),
    )(trg_f)

    value = partials.sum(axis=(0, 1))                 # (width,), f32
    if k > 1:
        value = value.reshape(k, trg_size).sum(axis=0)
    return score, value.astype(out_dtype)


def attention_ref(src, trg, weight, bias):
    raw = jnp.einsum('s,st,mt->m', src, weight[0], trg)[:, None] + bias[0]
    score = jax.nn.softmax(raw, axis=-1)
    value = (score.T @ trg)[0]
    return score, value


def _check_case(key, middle_node, src_size, trg_size, **kw):
    k_s, k_t, k_w, k_b = jax.random.split(key, 4)
    src = jax.random.normal(k_s, (src_size,), dtype=jnp.float32)
    trg = jax.random.normal(k_t, (middle_node, trg_size), dtype=jnp.float32)
    weight = jax.random.normal(k_w, (1, src_size, trg_size), dtype=jnp.float32) * 0.1
    bias = jax.random.normal(k_b, (1,), dtype=jnp.float32) * 0.1

    score, value = attention_forward(src, trg, weight, bias, **kw)
    score = jax.block_until_ready(score)
    value = jax.block_until_ready(value)

    score_r, value_r = attention_ref(src, trg, weight, bias)
    assert score.shape == (middle_node, 1), score.shape
    assert value.shape == (trg_size,), value.shape
    assert jnp.allclose(score, score_r, atol=1e-5, rtol=1e-5), "score mismatch"
    assert jnp.allclose(value, value_r, atol=1e-4, rtol=1e-4), "value mismatch"


if __name__ == "__main__":
    key = jax.random.PRNGKey(0)
    keys = jax.random.split(key, 3)

    # Small shapes matching the module docstring (src: [S], trg: [M, T]).
    _check_case(keys[0], middle_node=8, src_size=32, trg_size=32)
    # Multi-tile + lane-fold + 2-core split, evenly divisible (no mask path).
    _check_case(keys[1], middle_node=2048, src_size=32, trg_size=64, node_tile=256)
    # Ragged tail + phantom tiles on the second core (masked path).
    _check_case(keys[2], middle_node=1037, src_size=16, trg_size=80, node_tile=128)

    print("KERNEL_OK")
</pallas_src>

<mosaic_0001>
module attributes {stable_mosaic.version = 11 : i64} {
  func.func @_column_sum_kernel(%arg0: i32, %arg1: i32, %arg2: memref<2x128xf32, #tpu.memory_space<vmem>>, %arg3: memref<1x1x128xf32, #tpu.memory_space<vmem>>, %arg4: memref<1x128xf32, #tpu.memory_space<vmem>>) attributes {dimension_semantics = [#tpu.dimension_semantics<parallel>, #tpu.dimension_semantics<arbitrary>], iteration_bounds = array<i64: 1, 1>, scalar_prefetch = 0 : i64, scratch_operands = 1 : i64, tpu.core_type = #tpu.core_type<tc>, window_params = [{transform_indices = @transform_0, window_bounds = array<i64: 2, 128>}, {transform_indices = @transform_1, window_bounds = array<i64: 1, 1, 128>}]} {
    %c0_i32 = arith.constant 0 : i32
    %0 = arith.cmpi eq, %arg1, %c0_i32 : i32
    %1 = arith.extui %0 : i1 to i32
    %c0_i32_0 = arith.constant 0 : i32
    %2 = arith.cmpi ne, %1, %c0_i32_0 : i32
    scf.if %2 {
      %cst_8 = arith.constant 0.000000e+00 : f32
      %12 = vector.broadcast %cst_8 : f32 to vector<1x128xf32>
      %c0_9 = arith.constant 0 : index
      %c0_10 = arith.constant 0 : index
      %13 = vector.load %arg4[%c0_9, %c0_10] : memref<1x128xf32, #tpu.memory_space<vmem>>, vector<1x128xf32>
      tpu.vector_store %arg4[%c0_9, %c0_10], %12 {strides = array<i32>} : memref<1x128xf32, #tpu.memory_space<vmem>>, vector<1x128xf32>,
    } else {
    }
    %c0 = arith.constant 0 : index
    %c0_1 = arith.constant 0 : index
    %3 = vector.load %arg2[%c0, %c0_1] : memref<2x128xf32, #tpu.memory_space<vmem>>, vector<2x128xf32>
    %c0_2 = arith.constant 0 : index
    %c0_3 = arith.constant 0 : index
    %4 = vector.load %arg4[%c0_2, %c0_3] : memref<1x128xf32, #tpu.memory_space<vmem>>, vector<1x128xf32>
    %cst = arith.constant dense<0.000000e+00> : vector<128xf32>
    %5 = vector.multi_reduction <add>, %3, %cst [0] : vector<2x128xf32> to vector<128xf32>
    %6 = vector.shape_cast %5 : vector<128xf32> to vector<1x128xf32>
    %7 = arith.addf %4, %6 : vector<1x128xf32>
    %c0_4 = arith.constant 0 : index
    %c0_5 = arith.constant 0 : index
    %8 = vector.load %arg4[%c0_4, %c0_5] : memref<1x128xf32, #tpu.memory_space<vmem>>, vector<1x128xf32>
    tpu.vector_store %arg4[%c0_4, %c0_5], %7 {strides = array<i32>} : memref<1x128xf32, #tpu.memory_space<vmem>>, vector<1x128xf32>,
    %c0_i32_6 = arith.constant 0 : i32
    %9 = arith.cmpi eq, %arg1, %c0_i32_6 : i32
    %10 = arith.extui %9 : i1 to i32
    %c0_i32_7 = arith.constant 0 : i32
    %11 = arith.cmpi ne, %10, %c0_i32_7 : i32
    scf.if %11 {
      %c0_8 = arith.constant 0 : index
      %c0_9 = arith.constant 0 : index
      %12 = vector.load %arg4[%c0_8, %c0_9] : memref<1x128xf32, #tpu.memory_space<vmem>>, vector<1x128xf32>
      %13 = vector.shape_cast %12 : vector<1x128xf32> to vector<1x1x128xf32>
      %c0_10 = arith.constant 0 : index
      %c0_11 = arith.constant 0 : index
      %c0_12 = arith.constant 0 : index
      %14 = vector.load %arg3[%c0_10, %c0_11, %c0_12] : memref<1x1x128xf32, #tpu.memory_space<vmem>>, vector<1x1x128xf32>
      tpu.vector_store %arg3[%c0_10, %c0_11, %c0_12], %13 {strides = array<i32>} : memref<1x1x128xf32, #tpu.memory_space<vmem>>, vector<1x1x128xf32>,
    } else {
    }
    return
  }
  func.func @transform_0(%arg0: i32, %arg1: i32) -> (i32, i32) {
    %c1_i32 = arith.constant 1 : i32
    %0 = arith.muli %arg0, %c1_i32 : i32
    %1 = arith.addi %0, %arg1 : i32
    %c0_i32 = arith.constant 0 : i32
    %c0_i32_0 = arith.constant 0 : i32
    return %1, %c0_i32 : i32, i32
  }
  func.func @transform_1(%arg0: i32, %arg1: i32) -> (i32, i32, i32) {
    %c0_i32 = arith.constant 0 : i32
    %c0_i32_0 = arith.constant 0 : i32
    %c0_i32_1 = arith.constant 0 : i32
    return %arg0, %c0_i32, %c0_i32_0 : i32, i32, i32
  }
}

</mosaic_0001>

<bundles_post_ra>
// kernel: tpu_custom_call.1
= control target key start
LH: loop header
LB: loop body
LE: loop exit
PB: predicated region body
PF: predicated region fallthrough
CT: control target
= control target key end

     0   :  { %6 = vsyncpa [#allocation4], 0  ;;  %s150_s0 = inlined_call_operand.hbm [shape: f32[2,128], index: 0, kind: input, shape index: {}]   ;;  %s151_s1 = inlined_call_operand.hbm [shape: f32[1,1,128], index: 1, kind: output, shape index: {}]  }
   0x1   :  { %7 = vsyncpa [#allocation5], 0  ;;  %s113_s6 = smov [#allocation3]   ;;  %s65_s10 = scalar_lea.hbm %s150_s0, 32 }
   0x2   :  { %s17_s7 = sshll.u32 %s113_s6, 4  ;;  %p66_p0 = scmp.ne.s32.totalorder %s150_s0, %s65_s10  ;;  %s18_s7 = int_to_ptr.vmem [resolvable:$true] %s17_s7 }
   0x3   :  { %p69_p1 = scmp.lt.u32.totalorder %s65_s10, %s150_s0 }
   0x5   :  { %p71_p2 = pnand %p69_p1, %p66_p0 }
   0x7   :  { %74 = shalt.err (!%p71_p2)
}
   0x8   :  { %s75_s15 = scalar_lea.vmem %s18_s7, 32  ;;  %p80_p4 = scmp.lt.s32.totalorder %s18_s7, %s18_s7 }
   0x9   :  { %p76_p3 = scmp.ne.s32.totalorder %s18_s7, %s75_s15  ;;  %p81_p5 = scmp.lt.s32.totalorder %s75_s15, %s75_s15 }
   0xb   :  { %p82_p6 = por %p81_p5, %p80_p4 }
   0xd   :  { %p83_p7 = pnand %p82_p6, %p76_p3 }
   0xf   :  { %86 = shalt.err (!%p83_p7)
}
  0x10   :  { %20 = dma.hbm_to_vmem [thread:$0]  %s150_s0, 32, %s18_s7, [#allocation4]  }
  0x11   :  { %109 = dma.done.wait [#allocation4], 32  }
  0x12   :  { %110 = vsyncadd [#allocation4], 4294967264  ;;  %v114_v0 = vmov 0.0   ;;  %vm32_vm0 = vcmask 1041408   ;;  %v30_v1 = vld [vmem:[#allocation3] sm:$0x3] }
  0x13   :  { %29 = vst [vmem:[#allocation2] sm:$0x1] %v114_v0  ;;  %v33_v2 = vsel %vm32_vm0, %v30_v1, 0.0  ;;  %s115_s18 = smov [#allocation6]  }
  0x14   :  { %v34_v3 = vrot.slane %v33_v2, 4  ;;  %s53_s19 = sshll.u32 %s115_s18, 4  ;;  %s54_s19 = int_to_ptr.vmem [resolvable:$true] %s53_s19 }
  0x15   :  { %s87_s0 = scalar_lea.vmem %s54_s19, 16  ;;  %s91_s20 = scalar_lea.vmem %s54_s19, 32 }
  0x16   :  { %v35_v4 = vadd.f32 %v34_v3, %v33_v2  ;;  %p88_p8 = scmp.ne.s32.totalorder %s54_s19, %s87_s0  ;;  %p92_p9 = scmp.lt.s32.totalorder %s54_s19, %s54_s19 }
  0x17   :  { %p93_p10 = scmp.lt.s32.totalorder %s91_s20, %s87_s0 }
  0x18   :  { %v36_v5 = vrot.slane %v35_v4, 2 }
  0x19   :  { %p94_p11 = por %p93_p10, %p92_p9 }
  0x1a   :  { %v37_v6 = vadd.f32 %v36_v5, %v35_v4  ;;  %v31_v8 = vld [vmem:[#allocation2] sm:$0x1] }
  0x1b   :  { %p95_p12 = pnand %p94_p11, %p88_p8 }
  0x1c   :  { %v38_v7 = vrot.slane %v37_v6, 1 }
  0x1e   :  { %v39_v9 = vadd.f32 %v38_v7, %v37_v6 }
  0x20   :  { %v40_v10 = vadd.f32 %v39_v9, %v31_v8 }
  0x22   :  { %41 = vst [vmem:[#allocation2] sm:$0x1] %v40_v10 }
  0x29   :  { %v45_v11 = vld [vmem:[#allocation2] sm:$0x1] }
  0x2a   :  { %46 = vst [vmem:[#allocation6] sm:$0x1] %v45_v11 }
  0x2b   :  { %98 = shalt.err (!%p95_p12)
}
  0x2c   :  { %s99_s23 = scalar_lea.hbm %s151_s1, 16 }
  0x2d   :  { %p100_p13 = scmp.ne.s32.totalorder %s151_s1, %s99_s23  ;;  %p103_p0 = scmp.lt.u32.totalorder %s99_s23, %s151_s1 }
  0x2f   :  { %p105_p1 = pnand %p103_p0, %p100_p13 }
  0x31   :  { %108 = shalt.err (!%p105_p1)
}
  0x32   :  { %56 = dma.vmem_to_hbm [thread:$0]  %s54_s19, 16, %s151_s1, [#allocation5]  }
  0x33   :  { %111 = dma.done.wait [#allocation5], 16  }
  0x34   :  { %112 = vsyncadd [#allocation5], 4294967280 }
  0x35   :  { %60 = vsyncpa [#allocation4], 1 }
  0x36   :  { %61 = vsyncpa [#allocation5], 1 }

</bundles_post_ra>
